<compile_context>
chip_gen: v7x
topology: tpu7x:2x2x1
jax: 0.10.0
libtpu: 0.0.40
codegen_flags: <defaults>
</compile_context>

<pallas_src>
import jax
import jax.numpy as jnp
from jax.experimental import pallas as pl
from jax.experimental.pallas import tpu as pltpu

_TARGET_BLOCK_BYTES = 4 * 1024 * 1024   # per x block; x-in + out, double buffered ~ 4x
_MAX_TILE_ROWS = 4096                   # >=1024-row tiles already saturate HBM roofline


def _normalize_kernel(x_ref, off_ref, o_ref):
    # off_ref block is (tile_r, 1) or (1, tile_c); broadcasts against x block.
    o_ref[...] = x_ref[...] - off_ref[...]


def _vmem_limit_bytes():
    """Generation-aware scoped-VMEM limit: raise v5e's 16 MiB default, stay
    well under v7x's 64 MiB physical per-TC."""
    try:
        phys = int(pltpu.get_tpu_info().vmem_capacity_bytes)
    except Exception:
        phys = 64 * 1024 * 1024
    return min(40 * 1024 * 1024, max(phys // 2, 16 * 1024 * 1024))


def _row_axis_semantics(num_row_blocks):
    """CORE_PARALLEL on v7x (2 TC/chip) when there is enough balanced work;
    plain PARALLEL elsewhere (parallel vs arbitrary: near-zero codegen impact
    on single-TC chips)."""
    if num_row_blocks >= 2 and num_row_blocks % 2 == 0:
        try:
            kind = jax.devices()[0].device_kind.lower()
        except Exception:
            kind = ""
        if "v7" in kind:
            return pltpu.CORE_PARALLEL
    return pltpu.PARALLEL


def normalize(x, mean, std, *, target_block_bytes=_TARGET_BLOCK_BYTES,
              donate_x=False):
    """x: (N, C, H, W); mean, std: (C,). Returns x - (mean/std)[None,:,None,None]."""
    N, C, H, W = x.shape
    HW = H * W
    itemsize = jnp.dtype(x.dtype).itemsize

    # Fold mean/std into one per-channel constant (matches torch precedence:
    # mean.type_as(x) / std.type_as(x), then subtract).
    offset = mean.astype(x.dtype) / std.astype(x.dtype)             # (C,)

    # ---- lane-dense slab layout ---------------------------------------------
    if HW % 128 == 0 or (C * HW) % 128 != 0:
        # Layout A: rows = N*C, per-row offset column.  Lane-dense whenever
        # H*W is a multiple of 128; otherwise the full-extent last dim is
        # still legal (masked partial stores) and repacking would cost an
        # extra full copy of x, which is worse for a bandwidth-bound op.
        R, L = N * C, HW
        x2 = x.reshape(R, L)
        off = jnp.broadcast_to(offset[None, :], (N, C)).reshape(R, 1)
        off_is_col = True
    else:
        # Layout B: rows = N, lanes = C*H*W (a multiple of 128) -> unmasked,
        # lane-dense stores; offset becomes a (1, C*H*W) row (negligible HBM).
        R, L = N, C * HW
        x2 = x.reshape(R, L)
        off = jnp.broadcast_to(offset[:, None], (C, HW)).reshape(1, L)
        off_is_col = False

    # ---- tile selection (byte-targeted) ---------------------------------------
    sub = 32 if itemsize == 1 else (16 if itemsize == 2 else 8)     # sublane packing
    target_elems = max(sub * 128, target_block_bytes // itemsize)

    # Lane (column) tile: split very wide rows; otherwise keep full rows so
    # DMAs stay long and contiguous.
    if L % 128 == 0 and L * sub > target_elems:
        tile_c = min(L, max(128, ((target_elems // sub) // 128) * 128))
    else:
        tile_c = L
        # TODO(synk): a huge L that is not a multiple of 128 cannot be
        # lane-tiled without an extra repacking copy; such blocks may exceed
        # the byte target.

    # Row (sublane) tile.
    rows_fit = max(sub, ((target_elems // tile_c) // sub) * sub)
    rows_fit = min(rows_fit, _MAX_TILE_ROWS)
    tile_r = R if R <= rows_fit else rows_fit

    num_r = pl.cdiv(R, tile_r)
    num_c = pl.cdiv(L, tile_c)

    if off_is_col:
        off_spec = pl.BlockSpec((tile_r, 1), lambda i, j: (i, 0))
    else:
        off_spec = pl.BlockSpec((1, tile_c), lambda i, j: (0, j))

    out = pl.pallas_call(
        _normalize_kernel,
        out_shape=jax.ShapeDtypeStruct((R, L), x.dtype),
        grid=(num_r, num_c),
        in_specs=[
            pl.BlockSpec((tile_r, tile_c), lambda i, j: (i, j)),
            off_spec,
        ],
        out_specs=pl.BlockSpec((tile_r, tile_c), lambda i, j: (i, j)),
        compiler_params=pltpu.CompilerParams(
            dimension_semantics=(_row_axis_semantics(num_r), pltpu.ARBITRARY),
            vmem_limit_bytes=_vmem_limit_bytes(),
        ),
        # Aliasing x to the output halves peak HBM footprint when the caller
        # can donate x (no change in HBM traffic; off by default so callers
        # may keep using x).
        input_output_aliases={0: 0} if donate_x else {},
    )(x2, off)

    return out.reshape(N, C, H, W)


def _reference(x, mean, std):
    return x - (mean.astype(x.dtype) / std.astype(x.dtype))[None, :, None, None]


if __name__ == "__main__":
    key = jax.random.PRNGKey(0)

    # --- main demo (small shapes consistent with the module) ------------------
    N, C, H, W = 2, 4, 16, 16
    x = jax.random.normal(key, (N, C, H, W), dtype=jnp.float32)
    mean = jnp.array([0.4914, 0.4822, 0.4465, 0.5000], dtype=jnp.float32)
    std = jnp.array([0.2471, 0.2435, 0.2616, 0.2500], dtype=jnp.float32)

    out = jax.block_until_ready(normalize(x, mean, std))
    ref = _reference(x, mean, std)
    assert out.shape == x.shape and out.dtype == x.dtype
    assert jnp.allclose(out, ref, atol=1e-6, rtol=1e-6)

    # --- multi-block grid on both axes (tiny byte target forces tiling) -------
    k1 = jax.random.PRNGKey(1)
    xa = jax.random.normal(k1, (2, 8, 16, 16), dtype=jnp.float32)    # R=16, L=256
    ma = jnp.linspace(0.1, 0.9, 8, dtype=jnp.float32)
    sa = jnp.linspace(0.2, 0.4, 8, dtype=jnp.float32)
    outa = jax.block_until_ready(normalize(xa, ma, sa, target_block_bytes=4096))
    assert jnp.allclose(outa, _reference(xa, ma, sa), atol=1e-6, rtol=1e-6)

    # --- layout B: H*W not a multiple of 128, but C*H*W is --------------------
    k2 = jax.random.PRNGKey(2)
    xb = jax.random.normal(k2, (2, 2, 8, 8), dtype=jnp.float32)      # HW=64, C*HW=128
    mb = jnp.array([0.3, 0.6], dtype=jnp.float32)
    sb = jnp.array([0.25, 0.5], dtype=jnp.float32)
    outb = jax.block_until_ready(normalize(xb, mb, sb))
    assert jnp.allclose(outb, _reference(xb, mb, sb), atol=1e-6, rtol=1e-6)

    # --- layout A fallback: neither H*W nor C*H*W is a multiple of 128 --------
    k3 = jax.random.PRNGKey(3)
    xc = jax.random.normal(k3, (2, 3, 7, 7), dtype=jnp.float32)      # HW=49
    mc = jnp.array([0.485, 0.456, 0.406], dtype=jnp.float32)
    sc = jnp.array([0.229, 0.224, 0.225], dtype=jnp.float32)
    outc = jax.block_until_ready(normalize(xc, mc, sc))
    assert jnp.allclose(outc, _reference(xc, mc, sc), atol=1e-6, rtol=1e-6)

    print("KERNEL_OK")
</pallas_src>

<mosaic_0001>
module attributes {stable_mosaic.version = 11 : i64} {
  func.func @_normalize_kernel(%arg0: i32, %arg1: i32, %arg2: memref<8x256xf32, #tpu.memory_space<vmem>>, %arg3: memref<8x1xf32, #tpu.memory_space<vmem>>, %arg4: memref<8x256xf32, #tpu.memory_space<vmem>>) attributes {dimension_semantics = [#tpu.dimension_semantics<parallel>, #tpu.dimension_semantics<arbitrary>], iteration_bounds = array<i64: 1, 1>, scalar_prefetch = 0 : i64, scratch_operands = 0 : i64, tpu.core_type = #tpu.core_type<tc>, window_params = [{transform_indices = @transform_0, window_bounds = array<i64: 8, 256>}, {transform_indices = @transform_1, window_bounds = array<i64: 8, 1>}, {transform_indices = @transform_2, window_bounds = array<i64: 8, 256>}]} {
    %c0 = arith.constant 0 : index
    %c0_0 = arith.constant 0 : index
    %0 = vector.load %arg2[%c0, %c0_0] : memref<8x256xf32, #tpu.memory_space<vmem>>, vector<8x256xf32>
    %c0_1 = arith.constant 0 : index
    %c0_2 = arith.constant 0 : index
    %1 = vector.load %arg3[%c0_1, %c0_2] : memref<8x1xf32, #tpu.memory_space<vmem>>, vector<8x1xf32>
    %2 = vector.broadcast %1 : vector<8x1xf32> to vector<8x256xf32>
    %3 = arith.subf %0, %2 : vector<8x256xf32>
    %c0_3 = arith.constant 0 : index
    %c0_4 = arith.constant 0 : index
    %4 = vector.load %arg4[%c0_3, %c0_4] : memref<8x256xf32, #tpu.memory_space<vmem>>, vector<8x256xf32>
    tpu.vector_store %arg4[%c0_3, %c0_4], %3 {strides = array<i32>} : memref<8x256xf32, #tpu.memory_space<vmem>>, vector<8x256xf32>,
    return
  }
  func.func @transform_0(%arg0: i32, %arg1: i32) -> (i32, i32) {
    %c0_i32 = arith.constant 0 : i32
    return %arg0, %arg1 : i32, i32
  }
  func.func @transform_1(%arg0: i32, %arg1: i32) -> (i32, i32) {
    %c0_i32 = arith.constant 0 : i32
    %c0_i32_0 = arith.constant 0 : i32
    return %arg0, %c0_i32 : i32, i32
  }
  func.func @transform_2(%arg0: i32, %arg1: i32) -> (i32, i32) {
    %c0_i32 = arith.constant 0 : i32
    return %arg0, %arg1 : i32, i32
  }
}

</mosaic_0001>

<bundles_post_ra>
// kernel: tpu_custom_call.1
= control target key start
LH: loop header
LB: loop body
LE: loop exit
PB: predicated region body
PF: predicated region fallthrough
CT: control target
= control target key end

     0   :  { %7 = vsyncpa [#allocation3], 0  ;;  %s148_s0 = inlined_call_operand.hbm [shape: f32[8,256], index: 0, kind: input, shape index: {}]   ;;  %s149_s1 = inlined_call_operand.vmem [shape: f32[8,1], index: 1, kind: input, shape index: {}]   ;;  %s150_s2 = inlined_call_operand.hbm [shape: f32[8,256], index: 2, kind: output, shape index: {}]  }
   0x1   :  { %8 = vsyncpa [#allocation4], 0  ;;  %s103_s9 = smov [#allocation2]   ;;  %s55_s13 = scalar_lea.hbm %s148_s0, 256 }
   0x2   :  { %s15_s10 = sshll.u32 %s103_s9, 4  ;;  %p56_p0 = scmp.ne.s32.totalorder %s148_s0, %s55_s13  ;;  %s16_s10 = int_to_ptr.vmem [resolvable:$true] %s15_s10 }
   0x3   :  { %p59_p1 = scmp.lt.u32.totalorder %s55_s13, %s148_s0 }
   0x5   :  { %p61_p2 = pnand %p59_p1, %p56_p0 }
   0x7   :  { %64 = shalt.err (!%p61_p2)
}
   0x8   :  { %s65_s18 = scalar_lea.vmem %s16_s10, 256  ;;  %p70_p4 = scmp.lt.s32.totalorder %s16_s10, %s16_s10 }
   0x9   :  { %p66_p3 = scmp.ne.s32.totalorder %s16_s10, %s65_s18  ;;  %p71_p5 = scmp.lt.s32.totalorder %s65_s18, %s65_s18 }
   0xb   :  { %p72_p6 = por %p71_p5, %p70_p4 }
   0xd   :  { %p73_p7 = pnand %p72_p6, %p66_p3 }
   0xf   :  { %76 = shalt.err (!%p73_p7)
}
  0x10   :  { %18 = dma.hbm_to_vmem [thread:$0]  %s148_s0, 256, %s16_s10, [#allocation3]  }
  0x11   :  { %99 = dma.done.wait [#allocation3], 256  }
  0x12   :  { %100 = vsyncadd [#allocation3], 4294967040  ;;  %v104_v0 = vmov 0   ;;  %v26_v1 = vld [vmem:[%s149_s1] sm:$0xff]  ;;  %v25_v3 = vld [vmem:[#allocation2 + $0x8] sm:$0xff]  ;;  %s105_s23 = smov [#allocation5]  }
  0x13   :  { %54 = vset.pattern.permute.xlu0 %v104_v0  ;;  %v24_v2 = vld [vmem:[#allocation2] sm:$0xff]  ;;  %s42_s24 = sshll.u32 %s105_s23, 4  ;;  %s43_s24 = int_to_ptr.vmem [resolvable:$true] %s42_s24 }
  0x14   :  { %29 = vperm.xlu0 %54, %v26_v1   ;;  %s77_s0 = scalar_lea.vmem %s43_s24, 256  ;;  %p82_p9 = scmp.lt.s32.totalorder %s43_s24, %s43_s24 }
  0x15   :  { %p78_p8 = scmp.ne.s32.totalorder %s43_s24, %s77_s0  ;;  %p83_p10 = scmp.lt.s32.totalorder %s77_s0, %s77_s0 }
  0x17   :  { %p84_p11 = por %p83_p10, %p82_p9 }
  0x19   :  { %p85_p12 = pnand %p84_p11, %p78_p8 }
  0x93   :  { %v30_v4 = vpop.permute.xlu0 %29 }
  0x94   :  { %v32_v5 = vsub.f32 %v24_v2, %v30_v4  ;;  %v33_v6 = vsub.f32 %v25_v3, %v30_v4 }
  0x96   :  { %34 = vst [vmem:[#allocation5] sm:$0xff] %v32_v5  ;;  %35 = vst [vmem:[#allocation5 + $0x8] sm:$0xff] %v33_v6 }
  0x97   :  { %88 = shalt.err (!%p85_p12)
}
  0x98   :  { %s89_s26 = scalar_lea.hbm %s150_s2, 256 }
  0x99   :  { %p90_p13 = scmp.ne.s32.totalorder %s150_s2, %s89_s26  ;;  %p93_p0 = scmp.lt.u32.totalorder %s89_s26, %s150_s2 }
  0x9b   :  { %p95_p1 = pnand %p93_p0, %p90_p13 }
  0x9d   :  { %98 = shalt.err (!%p95_p1)
}
  0x9e   :  { %45 = dma.vmem_to_hbm [thread:$0]  %s43_s24, 256, %s150_s2, [#allocation4]  }
  0x9f   :  { %101 = dma.done.wait [#allocation4], 256  }
  0xa0   :  { %102 = vsyncadd [#allocation4], 4294967040 }
  0xa1   :  { %49 = vsyncpa [#allocation3], 1 }
  0xa2   :  { %50 = vsyncpa [#allocation4], 1 }

</bundles_post_ra>
